<compile_context>
chip_gen: v7x
topology: tpu7x:2x2x1
jax: 0.10.0
libtpu: 0.0.40
codegen_flags: <defaults>
</compile_context>

<pallas_src>
import functools

import jax
import jax.numpy as jnp
from jax.experimental import pallas as pl
from jax.experimental.pallas import tpu as pltpu


# ----------------------------------------------------------------------------
# Kernel: one image per program.  In-kernel constant padding + im2col + 1 matmul.
# ----------------------------------------------------------------------------
def _padded_conv2d_kernel(x_ref, w_ref, b_ref, rc_ref, o_ref, col_ref, *,
                          H, W, KH, KW, pad_value):
    Cin = x_ref.shape[1]
    HW = H * W
    ph, pw = (KH - 1) // 2, (KW - 1) // 2

    x = x_ref[0]                       # (Cin, H*W)  lane-dense flattened image
    hh = rc_ref[0:1, :]                # (1, H*W)    row index of each flat pixel
    ww = rc_ref[1:2, :]                # (1, H*W)    col index of each flat pixel

    # im2col with constant padding:
    # tap (dy, dx) of output pixel p needs input pixel p + s, s = (dy-ph)*W + (dx-pw),
    # or pad_value when that lands outside the image.  A lane roll by -s plus a
    # border mask implements exactly that (any wrapped lane is a masked position).
    for dy in range(KH):
        for dx in range(KW):
            t = dy * KW + dx
            s = (dy - ph) * W + (dx - pw)
            shifted = x if s == 0 else pltpu.roll(x, shift=(-s) % HW, axis=1)
            valid = ((hh >= ph - dy) & (hh < H + ph - dy) &
                     (ww >= pw - dx) & (ww < W + pw - dx))
            col_ref[t * Cin:(t + 1) * Cin, :] = jnp.where(valid, shifted, pad_value)

    # Single MXU matmul over the whole receptive field, then bias; lane-dense store.
    acc = jnp.dot(w_ref[...], col_ref[...], preferred_element_type=jnp.float32)
    o_ref[0] = (acc + b_ref[...]).astype(o_ref.dtype)


# ----------------------------------------------------------------------------
# Wrapper: PyTorch-NCHW in / NCHW out.  Only free reshapes + tiny index tables
# happen outside the kernel.
# ----------------------------------------------------------------------------
def padded_conv2d(x, w, b, *, pad_value=-1.0):
    """PaddedConv2d.forward: F.pad(x, [p]*4, value=pad_value) then Conv2d(k, padding=0).

    x: (N, Cin, H, W) f32   w: (Cout, Cin, KH, KW) f32 (torch OIHW)   b: (Cout,) f32
    Returns (N, Cout, H, W) f32.
    """
    N, Cin, H, W = x.shape
    Cout, Cin_w, KH, KW = w.shape
    assert Cin_w == Cin and KH % 2 == 1 and KW % 2 == 1, "odd 'same' kernels only"
    HW = H * W
    KKC = KH * KW * Cin

    # Wrapper-side layout plumbing (all free on contiguous NCHW / OIHW data).
    x2 = x.reshape(N, Cin, HW).astype(jnp.float32)                    # lane-dense activations
    w2 = jnp.transpose(w, (0, 2, 3, 1)).reshape(Cout, KKC).astype(jnp.float32)  # tap-major rows
    b2 = b.reshape(Cout, 1).astype(jnp.float32)
    p = jnp.arange(HW, dtype=jnp.int32)
    rowcol = jnp.stack([p // W, p % W], axis=0)                       # (2, H*W) border indices

    kernel = functools.partial(_padded_conv2d_kernel, H=H, W=W, KH=KH, KW=KW,
                               pad_value=float(pad_value))

    cost = pl.CostEstimate(
        flops=2 * N * HW * Cout * KKC,
        transcendentals=0,
        bytes_accessed=4 * (x2.size + w2.size + b2.size + rowcol.size + N * Cout * HW),
    )

    out = pl.pallas_call(
        kernel,
        out_shape=jax.ShapeDtypeStruct((N, Cout, HW), jnp.float32),
        grid=(N,),
        in_specs=[
            pl.BlockSpec((1, Cin, HW), lambda n: (n, 0, 0)),          # one image per program
            pl.BlockSpec((Cout, KKC), lambda n: (0, 0)),              # im2col-ordered weights
            pl.BlockSpec((Cout, 1), lambda n: (0, 0)),                # bias
            pl.BlockSpec((2, HW), lambda n: (0, 0)),                  # (row, col) index table
        ],
        out_specs=pl.BlockSpec((1, Cout, HW), lambda n: (n, 0, 0)),   # lane-dense output slab
        scratch_shapes=[pltpu.VMEM((KKC, HW), jnp.float32)],          # im2col scratch
        compiler_params=pltpu.CompilerParams(
            dimension_semantics=("parallel",)),                       # batch -> 2 TCs on v7x
        cost_estimate=cost,
    )(x2, w2, b2, rowcol)

    return out.reshape(N, Cout, H, W)


# ----------------------------------------------------------------------------
# Pure-JAX reference (for an in-script sanity check only).
# ----------------------------------------------------------------------------
def _reference(x, w, b, pad_value):
    ph = (w.shape[2] - 1) // 2
    pw = (w.shape[3] - 1) // 2
    xp = jnp.pad(x, ((0, 0), (0, 0), (ph, ph), (pw, pw)), constant_values=pad_value)
    y = jax.lax.conv_general_dilated(
        xp, w, window_strides=(1, 1), padding="VALID",
        dimension_numbers=("NCHW", "OIHW", "NCHW"),
        precision=jax.lax.Precision.HIGHEST)
    return y + b[None, :, None, None]


if __name__ == "__main__":
    key = jax.random.PRNGKey(0)
    kx, kw, kb = jax.random.split(key, 3)

    # Small shapes consistent with the module: NCHW (2, 4, 16, 16), Conv2d(4 -> 8, k=3).
    N, Cin, H, W = 2, 4, 16, 16
    Cout, K = 8, 3
    x = jax.random.normal(kx, (N, Cin, H, W), jnp.float32)
    bound = 1.0 / (Cin * K * K) ** 0.5                     # torch Conv2d default init scale
    w = jax.random.uniform(kw, (Cout, Cin, K, K), jnp.float32, -bound, bound)
    b = jax.random.uniform(kb, (Cout,), jnp.float32, -bound, bound)

    fwd = jax.jit(functools.partial(padded_conv2d, pad_value=-1.0))
    out = jax.block_until_ready(fwd(x, w, b))

    assert out.shape == (N, Cout, H, W), out.shape
    assert bool(jnp.all(jnp.isfinite(out)))
    ref = _reference(x, w, b, -1.0)
    assert bool(jnp.allclose(out, ref, atol=2e-2, rtol=2e-2)), \
        float(jnp.max(jnp.abs(out - ref)))
    print("KERNEL_OK")
</pallas_src>

<mosaic_0001>
module attributes {stable_mosaic.version = 11 : i64} {
  func.func @_padded_conv2d_kernel(%arg0: i32, %arg1: memref<1x4x256xf32, #tpu.memory_space<vmem>>, %arg2: memref<8x36xf32, #tpu.memory_space<vmem>>, %arg3: memref<8x1xf32, #tpu.memory_space<vmem>>, %arg4: memref<2x256xi32, #tpu.memory_space<vmem>>, %arg5: memref<1x8x256xf32, #tpu.memory_space<vmem>>, %arg6: memref<36x256xf32, #tpu.memory_space<vmem>>) attributes {dimension_semantics = [#tpu.dimension_semantics<parallel>], iteration_bounds = array<i64: 2>, scalar_prefetch = 0 : i64, scratch_operands = 1 : i64, tpu.core_type = #tpu.core_type<tc>, window_params = [{transform_indices = @transform_0, window_bounds = array<i64: 1, 4, 256>}, {pipeline_mode = #tpu.pipeline_mode<synchronous>, transform_indices = @transform_1, window_bounds = array<i64: 8, 36>}, {pipeline_mode = #tpu.pipeline_mode<synchronous>, transform_indices = @transform_2, window_bounds = array<i64: 8, 1>}, {pipeline_mode = #tpu.pipeline_mode<synchronous>, transform_indices = @transform_3, window_bounds = array<i64: 2, 256>}, {transform_indices = @transform_4, window_bounds = array<i64: 1, 8, 256>}]} {
    %c0 = arith.constant 0 : index
    %c0_0 = arith.constant 0 : index
    %c0_1 = arith.constant 0 : index
    %0 = vector.load %arg1[%c0, %c0_0, %c0_1] : memref<1x4x256xf32, #tpu.memory_space<vmem>>, vector<1x4x256xf32>
    %1 = vector.shape_cast %0 : vector<1x4x256xf32> to vector<4x256xf32>
    %c0_2 = arith.constant 0 : index
    %c0_3 = arith.constant 0 : index
    %2 = vector.load %arg4[%c0_2, %c0_3] : memref<2x256xi32, #tpu.memory_space<vmem>>, vector<1x256xi32>
    %c1 = arith.constant 1 : index
    %c0_4 = arith.constant 0 : index
    %3 = vector.load %arg4[%c1, %c0_4] : memref<2x256xi32, #tpu.memory_space<vmem>>, vector<1x256xi32>
    %c17_i32 = arith.constant 17 : i32
    %4 = tpu.dynamic_rotate %1 by %c17_i32 dim 1 : vector<4x256xf32>, i32 -> vector<4x256xf32>
    %c1_i32 = arith.constant 1 : i32
    %5 = vector.broadcast %c1_i32 : i32 to vector<1x256xi32>
    %6 = arith.cmpi sge, %2, %5 : vector<1x256xi32>
    %c17_i32_5 = arith.constant 17 : i32
    %7 = vector.broadcast %c17_i32_5 : i32 to vector<1x256xi32>
    %8 = arith.cmpi slt, %2, %7 : vector<1x256xi32>
    %9 = arith.andi %6, %8 : vector<1x256xi1>
    %c1_i32_6 = arith.constant 1 : i32
    %10 = vector.broadcast %c1_i32_6 : i32 to vector<1x256xi32>
    %11 = arith.cmpi sge, %3, %10 : vector<1x256xi32>
    %12 = arith.andi %9, %11 : vector<1x256xi1>
    %c17_i32_7 = arith.constant 17 : i32
    %13 = vector.broadcast %c17_i32_7 : i32 to vector<1x256xi32>
    %14 = arith.cmpi slt, %3, %13 : vector<1x256xi32>
    %15 = arith.andi %12, %14 : vector<1x256xi1>
    %cst = arith.constant -1.000000e+00 : f32
    %16 = vector.shape_cast %15 : vector<1x256xi1> to vector<1x256xi1>
    %17 = vector.broadcast %16 : vector<1x256xi1> to vector<4x256xi1>
    %18 = vector.broadcast %cst : f32 to vector<4x256xf32>
    %19 = arith.select %17, %4, %18 : vector<4x256xi1>, vector<4x256xf32>
    %c0_8 = arith.constant 0 : index
    %c0_9 = arith.constant 0 : index
    %20 = vector.load %arg6[%c0_8, %c0_9] : memref<36x256xf32, #tpu.memory_space<vmem>>, vector<4x256xf32>
    tpu.vector_store %arg6[%c0_8, %c0_9], %19 {strides = array<i32>} : memref<36x256xf32, #tpu.memory_space<vmem>>, vector<4x256xf32>,
    %c16_i32 = arith.constant 16 : i32
    %21 = tpu.dynamic_rotate %1 by %c16_i32 dim 1 : vector<4x256xf32>, i32 -> vector<4x256xf32>
    %c1_i32_10 = arith.constant 1 : i32
    %22 = vector.broadcast %c1_i32_10 : i32 to vector<1x256xi32>
    %23 = arith.cmpi sge, %2, %22 : vector<1x256xi32>
    %c17_i32_11 = arith.constant 17 : i32
    %24 = vector.broadcast %c17_i32_11 : i32 to vector<1x256xi32>
    %25 = arith.cmpi slt, %2, %24 : vector<1x256xi32>
    %26 = arith.andi %23, %25 : vector<1x256xi1>
    %c0_i32 = arith.constant 0 : i32
    %27 = vector.broadcast %c0_i32 : i32 to vector<1x256xi32>
    %28 = arith.cmpi sge, %3, %27 : vector<1x256xi32>
    %29 = arith.andi %26, %28 : vector<1x256xi1>
    %c16_i32_12 = arith.constant 16 : i32
    %30 = vector.broadcast %c16_i32_12 : i32 to vector<1x256xi32>
    %31 = arith.cmpi slt, %3, %30 : vector<1x256xi32>
    %32 = arith.andi %29, %31 : vector<1x256xi1>
    %cst_13 = arith.constant -1.000000e+00 : f32
    %33 = vector.shape_cast %32 : vector<1x256xi1> to vector<1x256xi1>
    %34 = vector.broadcast %33 : vector<1x256xi1> to vector<4x256xi1>
    %35 = vector.broadcast %cst_13 : f32 to vector<4x256xf32>
    %36 = arith.select %34, %21, %35 : vector<4x256xi1>, vector<4x256xf32>
    %c4 = arith.constant 4 : index
    %c0_14 = arith.constant 0 : index
    %37 = vector.load %arg6[%c4, %c0_14] : memref<36x256xf32, #tpu.memory_space<vmem>>, vector<4x256xf32>
    tpu.vector_store %arg6[%c4, %c0_14], %36 {strides = array<i32>} : memref<36x256xf32, #tpu.memory_space<vmem>>, vector<4x256xf32>,
    %c15_i32 = arith.constant 15 : i32
    %38 = tpu.dynamic_rotate %1 by %c15_i32 dim 1 : vector<4x256xf32>, i32 -> vector<4x256xf32>
    %c1_i32_15 = arith.constant 1 : i32
    %39 = vector.broadcast %c1_i32_15 : i32 to vector<1x256xi32>
    %40 = arith.cmpi sge, %2, %39 : vector<1x256xi32>
    %c17_i32_16 = arith.constant 17 : i32
    %41 = vector.broadcast %c17_i32_16 : i32 to vector<1x256xi32>
    %42 = arith.cmpi slt, %2, %41 : vector<1x256xi32>
    %43 = arith.andi %40, %42 : vector<1x256xi1>
    %c-1_i32 = arith.constant -1 : i32
    %44 = vector.broadcast %c-1_i32 : i32 to vector<1x256xi32>
    %45 = arith.cmpi sge, %3, %44 : vector<1x256xi32>
    %46 = arith.andi %43, %45 : vector<1x256xi1>
    %c15_i32_17 = arith.constant 15 : i32
    %47 = vector.broadcast %c15_i32_17 : i32 to vector<1x256xi32>
    %48 = arith.cmpi slt, %3, %47 : vector<1x256xi32>
    %49 = arith.andi %46, %48 : vector<1x256xi1>
    %cst_18 = arith.constant -1.000000e+00 : f32
    %50 = vector.shape_cast %49 : vector<1x256xi1> to vector<1x256xi1>
    %51 = vector.broadcast %50 : vector<1x256xi1> to vector<4x256xi1>
    %52 = vector.broadcast %cst_18 : f32 to vector<4x256xf32>
    %53 = arith.select %51, %38, %52 : vector<4x256xi1>, vector<4x256xf32>
    %c8 = arith.constant 8 : index
    %c0_19 = arith.constant 0 : index
    %54 = vector.load %arg6[%c8, %c0_19] : memref<36x256xf32, #tpu.memory_space<vmem>>, vector<4x256xf32>
    tpu.vector_store %arg6[%c8, %c0_19], %53 {strides = array<i32>} : memref<36x256xf32, #tpu.memory_space<vmem>>, vector<4x256xf32>,
    %c1_i32_20 = arith.constant 1 : i32
    %55 = tpu.dynamic_rotate %1 by %c1_i32_20 dim 1 : vector<4x256xf32>, i32 -> vector<4x256xf32>
    %c0_i32_21 = arith.constant 0 : i32
    %56 = vector.broadcast %c0_i32_21 : i32 to vector<1x256xi32>
    %57 = arith.cmpi sge, %2, %56 : vector<1x256xi32>
    %c16_i32_22 = arith.constant 16 : i32
    %58 = vector.broadcast %c16_i32_22 : i32 to vector<1x256xi32>
    %59 = arith.cmpi slt, %2, %58 : vector<1x256xi32>
    %60 = arith.andi %57, %59 : vector<1x256xi1>
    %c1_i32_23 = arith.constant 1 : i32
    %61 = vector.broadcast %c1_i32_23 : i32 to vector<1x256xi32>
    %62 = arith.cmpi sge, %3, %61 : vector<1x256xi32>
    %63 = arith.andi %60, %62 : vector<1x256xi1>
    %c17_i32_24 = arith.constant 17 : i32
    %64 = vector.broadcast %c17_i32_24 : i32 to vector<1x256xi32>
    %65 = arith.cmpi slt, %3, %64 : vector<1x256xi32>
    %66 = arith.andi %63, %65 : vector<1x256xi1>
    %cst_25 = arith.constant -1.000000e+00 : f32
    %67 = vector.shape_cast %66 : vector<1x256xi1> to vector<1x256xi1>
    %68 = vector.broadcast %67 : vector<1x256xi1> to vector<4x256xi1>
    %69 = vector.broadcast %cst_25 : f32 to vector<4x256xf32>
    %70 = arith.select %68, %55, %69 : vector<4x256xi1>, vector<4x256xf32>
    %c12 = arith.constant 12 : index
    %c0_26 = arith.constant 0 : index
    %71 = vector.load %arg6[%c12, %c0_26] : memref<36x256xf32, #tpu.memory_space<vmem>>, vector<4x256xf32>
    tpu.vector_store %arg6[%c12, %c0_26], %70 {strides = array<i32>} : memref<36x256xf32, #tpu.memory_space<vmem>>, vector<4x256xf32>,
    %c0_i32_27 = arith.constant 0 : i32
    %72 = vector.broadcast %c0_i32_27 : i32 to vector<1x256xi32>
    %73 = arith.cmpi sge, %2, %72 : vector<1x256xi32>
    %c16_i32_28 = arith.constant 16 : i32
    %74 = vector.broadcast %c16_i32_28 : i32 to vector<1x256xi32>
    %75 = arith.cmpi slt, %2, %74 : vector<1x256xi32>
    %76 = arith.andi %73, %75 : vector<1x256xi1>
    %c0_i32_29 = arith.constant 0 : i32
    %77 = vector.broadcast %c0_i32_29 : i32 to vector<1x256xi32>
    %78 = arith.cmpi sge, %3, %77 : vector<1x256xi32>
    %79 = arith.andi %76, %78 : vector<1x256xi1>
    %c16_i32_30 = arith.constant 16 : i32
    %80 = vector.broadcast %c16_i32_30 : i32 to vector<1x256xi32>
    %81 = arith.cmpi slt, %3, %80 : vector<1x256xi32>
    %82 = arith.andi %79, %81 : vector<1x256xi1>
    %cst_31 = arith.constant -1.000000e+00 : f32
    %83 = vector.shape_cast %82 : vector<1x256xi1> to vector<1x256xi1>
    %84 = vector.broadcast %83 : vector<1x256xi1> to vector<4x256xi1>
    %85 = vector.broadcast %cst_31 : f32 to vector<4x256xf32>
    %86 = arith.select %84, %1, %85 : vector<4x256xi1>, vector<4x256xf32>
    %c16 = arith.constant 16 : index
    %c0_32 = arith.constant 0 : index
    %87 = vector.load %arg6[%c16, %c0_32] : memref<36x256xf32, #tpu.memory_space<vmem>>, vector<4x256xf32>
    tpu.vector_store %arg6[%c16, %c0_32], %86 {strides = array<i32>} : memref<36x256xf32, #tpu.memory_space<vmem>>, vector<4x256xf32>,
    %c255_i32 = arith.constant 255 : i32
    %88 = tpu.dynamic_rotate %1 by %c255_i32 dim 1 : vector<4x256xf32>, i32 -> vector<4x256xf32>
    %c0_i32_33 = arith.constant 0 : i32
    %89 = vector.broadcast %c0_i32_33 : i32 to vector<1x256xi32>
    %90 = arith.cmpi sge, %2, %89 : vector<1x256xi32>
    %c16_i32_34 = arith.constant 16 : i32
    %91 = vector.broadcast %c16_i32_34 : i32 to vector<1x256xi32>
    %92 = arith.cmpi slt, %2, %91 : vector<1x256xi32>
    %93 = arith.andi %90, %92 : vector<1x256xi1>
    %c-1_i32_35 = arith.constant -1 : i32
    %94 = vector.broadcast %c-1_i32_35 : i32 to vector<1x256xi32>
    %95 = arith.cmpi sge, %3, %94 : vector<1x256xi32>
    %96 = arith.andi %93, %95 : vector<1x256xi1>
    %c15_i32_36 = arith.constant 15 : i32
    %97 = vector.broadcast %c15_i32_36 : i32 to vector<1x256xi32>
    %98 = arith.cmpi slt, %3, %97 : vector<1x256xi32>
    %99 = arith.andi %96, %98 : vector<1x256xi1>
    %cst_37 = arith.constant -1.000000e+00 : f32
    %100 = vector.shape_cast %99 : vector<1x256xi1> to vector<1x256xi1>
    %101 = vector.broadcast %100 : vector<1x256xi1> to vector<4x256xi1>
    %102 = vector.broadcast %cst_37 : f32 to vector<4x256xf32>
    %103 = arith.select %101, %88, %102 : vector<4x256xi1>, vector<4x256xf32>
    %c20 = arith.constant 20 : index
    %c0_38 = arith.constant 0 : index
    %104 = vector.load %arg6[%c20, %c0_38] : memref<36x256xf32, #tpu.memory_space<vmem>>, vector<4x256xf32>
    tpu.vector_store %arg6[%c20, %c0_38], %103 {strides = array<i32>} : memref<36x256xf32, #tpu.memory_space<vmem>>, vector<4x256xf32>,
    %c241_i32 = arith.constant 241 : i32
    %105 = tpu.dynamic_rotate %1 by %c241_i32 dim 1 : vector<4x256xf32>, i32 -> vector<4x256xf32>
    %c-1_i32_39 = arith.constant -1 : i32
    %106 = vector.broadcast %c-1_i32_39 : i32 to vector<1x256xi32>
    %107 = arith.cmpi sge, %2, %106 : vector<1x256xi32>
    %c15_i32_40 = arith.constant 15 : i32
    %108 = vector.broadcast %c15_i32_40 : i32 to vector<1x256xi32>
    %109 = arith.cmpi slt, %2, %108 : vector<1x256xi32>
    %110 = arith.andi %107, %109 : vector<1x256xi1>
    %c1_i32_41 = arith.constant 1 : i32
    %111 = vector.broadcast %c1_i32_41 : i32 to vector<1x256xi32>
    %112 = arith.cmpi sge, %3, %111 : vector<1x256xi32>
    %113 = arith.andi %110, %112 : vector<1x256xi1>
    %c17_i32_42 = arith.constant 17 : i32
    %114 = vector.broadcast %c17_i32_42 : i32 to vector<1x256xi32>
    %115 = arith.cmpi slt, %3, %114 : vector<1x256xi32>
    %116 = arith.andi %113, %115 : vector<1x256xi1>
    %cst_43 = arith.constant -1.000000e+00 : f32
    %117 = vector.shape_cast %116 : vector<1x256xi1> to vector<1x256xi1>
    %118 = vector.broadcast %117 : vector<1x256xi1> to vector<4x256xi1>
    %119 = vector.broadcast %cst_43 : f32 to vector<4x256xf32>
    %120 = arith.select %118, %105, %119 : vector<4x256xi1>, vector<4x256xf32>
    %c24 = arith.constant 24 : index
    %c0_44 = arith.constant 0 : index
    %121 = vector.load %arg6[%c24, %c0_44] : memref<36x256xf32, #tpu.memory_space<vmem>>, vector<4x256xf32>
    tpu.vector_store %arg6[%c24, %c0_44], %120 {strides = array<i32>} : memref<36x256xf32, #tpu.memory_space<vmem>>, vector<4x256xf32>,
    %c240_i32 = arith.constant 240 : i32
    %122 = tpu.dynamic_rotate %1 by %c240_i32 dim 1 : vector<4x256xf32>, i32 -> vector<4x256xf32>
    %c-1_i32_45 = arith.constant -1 : i32
    %123 = vector.broadcast %c-1_i32_45 : i32 to vector<1x256xi32>
    %124 = arith.cmpi sge, %2, %123 : vector<1x256xi32>
    %c15_i32_46 = arith.constant 15 : i32
    %125 = vector.broadcast %c15_i32_46 : i32 to vector<1x256xi32>
    %126 = arith.cmpi slt, %2, %125 : vector<1x256xi32>
    %127 = arith.andi %124, %126 : vector<1x256xi1>
    %c0_i32_47 = arith.constant 0 : i32
    %128 = vector.broadcast %c0_i32_47 : i32 to vector<1x256xi32>
    %129 = arith.cmpi sge, %3, %128 : vector<1x256xi32>
    %130 = arith.andi %127, %129 : vector<1x256xi1>
    %c16_i32_48 = arith.constant 16 : i32
    %131 = vector.broadcast %c16_i32_48 : i32 to vector<1x256xi32>
    %132 = arith.cmpi slt, %3, %131 : vector<1x256xi32>
    %133 = arith.andi %130, %132 : vector<1x256xi1>
    %cst_49 = arith.constant -1.000000e+00 : f32
    %134 = vector.shape_cast %133 : vector<1x256xi1> to vector<1x256xi1>
    %135 = vector.broadcast %134 : vector<1x256xi1> to vector<4x256xi1>
    %136 = vector.broadcast %cst_49 : f32 to vector<4x256xf32>
    %137 = arith.select %135, %122, %136 : vector<4x256xi1>, vector<4x256xf32>
    %c28 = arith.constant 28 : index
    %c0_50 = arith.constant 0 : index
    %138 = vector.load %arg6[%c28, %c0_50] : memref<36x256xf32, #tpu.memory_space<vmem>>, vector<4x256xf32>
    tpu.vector_store %arg6[%c28, %c0_50], %137 {strides = array<i32>} : memref<36x256xf32, #tpu.memory_space<vmem>>, vector<4x256xf32>,
    %c239_i32 = arith.constant 239 : i32
    %139 = tpu.dynamic_rotate %1 by %c239_i32 dim 1 : vector<4x256xf32>, i32 -> vector<4x256xf32>
    %c-1_i32_51 = arith.constant -1 : i32
    %140 = vector.broadcast %c-1_i32_51 : i32 to vector<1x256xi32>
    %141 = arith.cmpi sge, %2, %140 : vector<1x256xi32>
    %c15_i32_52 = arith.constant 15 : i32
    %142 = vector.broadcast %c15_i32_52 : i32 to vector<1x256xi32>
    %143 = arith.cmpi slt, %2, %142 : vector<1x256xi32>
    %144 = arith.andi %141, %143 : vector<1x256xi1>
    %c-1_i32_53 = arith.constant -1 : i32
    %145 = vector.broadcast %c-1_i32_53 : i32 to vector<1x256xi32>
    %146 = arith.cmpi sge, %3, %145 : vector<1x256xi32>
    %147 = arith.andi %144, %146 : vector<1x256xi1>
    %c15_i32_54 = arith.constant 15 : i32
    %148 = vector.broadcast %c15_i32_54 : i32 to vector<1x256xi32>
    %149 = arith.cmpi slt, %3, %148 : vector<1x256xi32>
    %150 = arith.andi %147, %149 : vector<1x256xi1>
    %cst_55 = arith.constant -1.000000e+00 : f32
    %151 = vector.shape_cast %150 : vector<1x256xi1> to vector<1x256xi1>
    %152 = vector.broadcast %151 : vector<1x256xi1> to vector<4x256xi1>
    %153 = vector.broadcast %cst_55 : f32 to vector<4x256xf32>
    %154 = arith.select %152, %139, %153 : vector<4x256xi1>, vector<4x256xf32>
    %c32 = arith.constant 32 : index
    %c0_56 = arith.constant 0 : index
    %155 = vector.load %arg6[%c32, %c0_56] : memref<36x256xf32, #tpu.memory_space<vmem>>, vector<4x256xf32>
    tpu.vector_store %arg6[%c32, %c0_56], %154 {strides = array<i32>} : memref<36x256xf32, #tpu.memory_space<vmem>>, vector<4x256xf32>,
    %c0_57 = arith.constant 0 : index
    %c0_58 = arith.constant 0 : index
    %156 = vector.load %arg2[%c0_57, %c0_58] : memref<8x36xf32, #tpu.memory_space<vmem>>, vector<8x36xf32>
    %c0_59 = arith.constant 0 : index
    %c0_60 = arith.constant 0 : index
    %157 = vector.load %arg6[%c0_59, %c0_60] : memref<36x256xf32, #tpu.memory_space<vmem>>, vector<36x256xf32>
    %cst_61 = arith.constant dense<0.000000e+00> : vector<8x256xf32>
    %158 = tpu.matmul %156, %157, %cst_61 {dimension_numbers = #tpu.dot_dimension_numbers<[1], [0], [0], [1], [0, 0, 1, 1], [], []>} : vector<8x36xf32>, vector<36x256xf32>, vector<8x256xf32> -> vector<8x256xf32>
    %c0_62 = arith.constant 0 : index
    %c0_63 = arith.constant 0 : index
    %159 = vector.load %arg3[%c0_62, %c0_63] : memref<8x1xf32, #tpu.memory_space<vmem>>, vector<8x1xf32>
    %160 = vector.broadcast %159 : vector<8x1xf32> to vector<8x256xf32>
    %161 = arith.addf %158, %160 : vector<8x256xf32>
    %c0_64 = arith.constant 0 : index
    %c0_65 = arith.constant 0 : index
    %c0_66 = arith.constant 0 : index
    %162 = vector.load %arg5[%c0_64, %c0_65, %c0_66] : memref<1x8x256xf32, #tpu.memory_space<vmem>>, vector<1x8x256xf32>
    %163 = vector.shape_cast %162 : vector<1x8x256xf32> to vector<8x256xf32>
    %164 = vector.shape_cast %161 : vector<8x256xf32> to vector<1x8x256xf32>
    tpu.vector_store %arg5[%c0_64, %c0_65, %c0_66], %164 {strides = array<i32>} : memref<1x8x256xf32, #tpu.memory_space<vmem>>, vector<1x8x256xf32>,
    return
  }
  func.func @transform_0(%arg0: i32) -> (i32, i32, i32) {
    %c0_i32 = arith.constant 0 : i32
    %c0_i32_0 = arith.constant 0 : i32
    %c0_i32_1 = arith.constant 0 : i32
    return %arg0, %c0_i32, %c0_i32_0 : i32, i32, i32
  }
  func.func @transform_1(%arg0: i32) -> (i32, i32) {
    %c0_i32 = arith.constant 0 : i32
    %c0_i32_0 = arith.constant 0 : i32
    %c0_i32_1 = arith.constant 0 : i32
    return %c0_i32, %c0_i32_0 : i32, i32
  }
  func.func @transform_2(%arg0: i32) -> (i32, i32) {
    %c0_i32 = arith.constant 0 : i32
    %c0_i32_0 = arith.constant 0 : i32
    %c0_i32_1 = arith.constant 0 : i32
    return %c0_i32, %c0_i32_0 : i32, i32
  }
  func.func @transform_3(%arg0: i32) -> (i32, i32) {
    %c0_i32 = arith.constant 0 : i32
    %c0_i32_0 = arith.constant 0 : i32
    %c0_i32_1 = arith.constant 0 : i32
    return %c0_i32, %c0_i32_0 : i32, i32
  }
  func.func @transform_4(%arg0: i32) -> (i32, i32, i32) {
    %c0_i32 = arith.constant 0 : i32
    %c0_i32_0 = arith.constant 0 : i32
    %c0_i32_1 = arith.constant 0 : i32
    return %arg0, %c0_i32, %c0_i32_0 : i32, i32, i32
  }
}

</mosaic_0001>

<bundles_post_ra>
// kernel: padded_conv2d.1
= control target key start
LH: loop header
LB: loop body
LE: loop exit
PB: predicated region body
PF: predicated region fallthrough
CT: control target
= control target key end

     0   :  { %s699_s15 = smov 0   ;;  %s1026_s0 = inlined_call_operand.vmem [shape: f32[2,4,256], index: 0, kind: input, shape index: {}]   ;;  %s1027_s1 = inlined_call_operand.vmem [shape: f32[8,36], index: 1, kind: input, shape index: {}]   ;;  %s1028_s2 = inlined_call_operand.vmem [shape: f32[8,1], index: 2, kind: input, shape index: {}]   ;;  %s1029_s3 = inlined_call_operand.vmem [shape: s32[2,256], index: 3, kind: input, shape index: {}]   ;;  %s1030_s4 = inlined_call_operand.vmem [shape: f32[2,8,256], index: 4, kind: output, shape index: {}]  }
   0x1 LB: > { %s611_s16 = sadd.s32 4294967295, %s662_s15   ;;  %p615_p0 = scmp.ge.s32.totalorder %s662_s15, 1  ;;  %s662_s15 = sphi %s699_s15, %s14_s15  }
   0x2   : > { %p162_p1 = scmp.lt.s32.totalorder %s662_s15, 3 }
   0x4   : > { %p163_p2 = pnand %p615_p0, %p162_p1 }
   0x5   : > { %p188_p3 = scmp.lt.s32.totalorder (!%p163_p2), %s611_s16, 1  ;;  %v710_v0 = vld [vmem:[%s1029_s3] ss:$2 sm:$0x3] (!%p163_p2)  ;;  %v209_v1 = vlaneseq (!%p163_p2)  ;;  %v664_v3 = vmov (!%p163_p2), 0   ;;  %s665_s25 = smov (!%p163_p2), 1  }
   0x6   : > { %166 = sbr.rel (%p163_p2) target bundleno = 390 (0x186), region = 36  ;;  %v715_v2 = vld [vmem:[%s1029_s3 + $0x1] ss:$2 sm:$0x3] (!%p163_p2)  ;;  %vm301_vm0 = vcmp.ge.s32.totalorder (!%p163_p2), %v710_v0, 0  ;;  %654 = vset.pattern.permute.xlu0 (!%p163_p2), %v664_v3  ;;  %vm302_vm3 = vcmp.lt.s32.totalorder (!%p163_p2), %v710_v0, 16 }
   0x7   : > { %vm217_vm1 = vcmp.ge.s32.totalorder (!%p163_p2), %v715_v2, 1  ;;  %v223_v4 = vshrl.u32 (!%p163_p2), %v209_v1, 7  ;;  %vm219_vm2 = vcmp.lt.s32.totalorder (!%p163_p2), %v715_v2, 17  ;;  %vm730_vm4 = vmand (!%p163_p2), %vm301_vm0, %vm302_vm3  ;;  %vm214_vm5 = vcmp.ge.s32.totalorder (!%p163_p2), %v710_v0, 1  ;;  %s666_s26 = smov (!%p163_p2), 16   ;;  %s667_s27 = smov (!%p163_p2), 17  }
   0x8   : > { %vm215_vm6 = vcmp.lt.s32.totalorder (!%p163_p2), %v710_v0, 17  ;;  %vm304_vm7 = vmand (!%p163_p2), %vm730_vm4, %vm217_vm1  ;;  %vm243_vm10 = vcmp.ge.s32.totalorder (!%p163_p2), %v715_v2, 0  ;;  %vm245_vm12 = vcmp.lt.s32.totalorder (!%p163_p2), %v715_v2, 16  ;;  %vm275_vm0 = vcmp.ge.s32.totalorder (!%p163_p2), %v715_v2, 4294967295  ;;  %s668_s28 = smov (!%p163_p2), 15   ;;  %s669_s29 = smov (!%p163_p2), 127  }
   0x9   : > { %v726_v5 = vsub.s32 (!%p163_p2), 0, %v223_v4  ;;  %v728_v6 = vsub.s32 (!%p163_p2), 1, %v223_v4  ;;  %vm305_vm8 = vmand (!%p163_p2), %vm304_vm7, %vm219_vm2  ;;  %s670_s30 = smov (!%p163_p2), 112   ;;  %s671_s5 = smov (!%p163_p2), 113   ;;  %v673_v41 = vmov (!%p163_p2), 0.0   ;;  %v466_v42 = vld [vmem:[%s1028_s2] sm:$0xff] (!%p163_p2) }
   0xa   : > { %v754_v10 = vsel (!%p163_p2), %vm305_vm8, 1, %v664_v3  ;;  %vm756_vm9 = vmand (!%p163_p2), %vm214_vm5, %vm215_vm6  ;;  %vm277_vm5 = vcmp.lt.s32.totalorder (!%p163_p2), %v715_v2, 15  ;;  %s672_s6 = smov (!%p163_p2), 111   ;;  %547 = vmatprep.mubr.f32.mxu0 (!%p163_p2), %v673_v41  ;;  %v894_v43 = vand.u32 (!%p163_p2), 127, %v209_v1 }
   0xb   : > { %v310_v12 = vrot.slane (!%p163_p2), %v754_v10, %v726_v5  ;;  %v314_v13 = vrot.slane (!%p163_p2), %v754_v10, %v728_v6  ;;  %vm218_vm11 = vmand (!%p163_p2), %vm756_vm9, %vm217_vm1 }
   0xc   : > { %vm220_vm13 = vmand (!%p163_p2), %vm218_vm11, %vm219_vm2  ;;  %vm381_vm11 = vcmp.ge.s32.totalorder (!%p163_p2), %v710_v0, 4294967295 }
   0xd   : > { %s1054_s16 = smov (!%p188_p3, %s611_s16), 1  ;;  %v773_v14 = vsel %vm220_vm13, 1, %v664_v3  ;;  %vm244_vm14 = vmand %vm756_vm9, %vm243_vm10  ;;  %vm382_vm13 = vcmp.lt.s32.totalorder %v710_v0, 15 }
   0xe   : > { %s626_s21 = sshll.u32 %s1054_s16, 3  ;;  %v225_v15 = vrot.slane %v773_v14, %v726_v5  ;;  %v229_v16 = vrot.slane %v773_v14, %v728_v6  ;;  %vm246_vm15 = vmand %vm244_vm14, %vm245_vm12  ;;  %s627_s11 = sshll.u32 %s1054_s16, 4 }
   0xf   : > { %s192_s24 = scalar_lea.vmem %s1026_s0, %s626_s21  ;;  %v789_v17 = vsel %vm246_vm15, 1, %v664_v3  ;;  %vm327_vm3 = vmand %vm730_vm4, %vm243_vm10  ;;  %s197_s14 = scalar_lea.vmem %s1030_s4, %s627_s11 }
  0x10   : > { %v743_v8 = vld [vmem:[%s192_s24] sm:$0xff]  ;;  %v251_v18 = vrot.slane %v789_v17, %v726_v5  ;;  %v255_v19 = vrot.slane %v789_v17, %v728_v6  ;;  %vm328_vm6 = vmand %vm327_vm3, %vm245_vm12 }
  0x11   : > { %294 = vrot.lane.b32.xlu1 %v743_v8, %s665_s25  ;;  %236 = vrot.lane.b32.xlu0 %v743_v8, %s666_s26  ;;  %v751_v9 = vcombine.high %v743_v8, %v743_v8  ;;  %v329_v20 = vsel %vm328_vm6, 1, %v664_v3  ;;  %vm276_vm7 = vmand %vm756_vm9, %vm275_vm0 }
  0x12   : > { %v333_v21 = vrot.slane %v329_v20, %v726_v5  ;;  %v337_v22 = vrot.slane %v329_v20, %v728_v6  ;;  %vm278_vm8 = vmand %vm276_vm7, %vm277_vm5 }
  0x13   : > { %v816_v23 = vsel %vm278_vm8, 1, %v664_v3  ;;  %vm351_vm9 = vmand %vm730_vm4, %vm275_vm0 }
  0x14   : > { %vm338_vm14 = vcmp.eq.s32.totalorder %v333_v21, 1  ;;  %vm339_vm15 = vcmp.eq.s32.totalorder %v337_v22, 1  ;;  %v283_v24 = vrot.slane %v816_v23, %v726_v5  ;;  %v287_v25 = vrot.slane %v816_v23, %v728_v6  ;;  %vm352_vm3 = vmand %vm351_vm9, %vm277_vm5 }
  0x15   : > { %205 = vrot.lane.b32.xlu0 %v743_v8, %s667_s27  ;;  %296 = vrot.lane.b32.xlu1 %v751_v9, %s665_s25  ;;  %v340_v26 = vsel %vm338_vm14, %v743_v8, -1.0  ;;  %v341_v27 = vsel %vm339_vm15, %v751_v9, -1.0  ;;  %v831_v28 = vsel %vm352_vm3, 1, %v664_v3  ;;  %vm833_vm6 = vmand %vm381_vm11, %vm382_vm13  ;;  %vm211_vm11 = vcmp.lt.s32.totalorder %v894_v43, 17 }
  0x16   : > { %342 = vst [vmem:[#allocation2 + $0x20] sm:$0xf] %v340_v26  ;;  %343 = vst [vmem:[#allocation2 + $0x28] sm:$0xf] %v341_v27  ;;  %v357_v30 = vrot.slane %v831_v28, %v726_v5  ;;  %v361_v31 = vrot.slane %v831_v28, %v728_v6  ;;  %vm240_vm13 = vcmp.lt.s32.totalorder %v894_v43, 16  ;;  %vm908_vm9 = vcmp.eq.s32.totalorder %v225_v15, 1 }
  0x17   : > { %vm408_vm4 = vmand %vm833_vm6, %vm243_vm10  ;;  %vm915_vm14 = vcmp.eq.s32.totalorder %v229_v16, 1  ;;  %vm922_vm15 = vcmp.eq.s32.totalorder %v251_v18, 1  ;;  %vm929_vm3 = vcmp.eq.s32.totalorder %v255_v19, 1 }
  0x18   : > { %vm409_vm7 = vmand %vm408_vm4, %vm245_vm12  ;;  %vm298_vm12 = vcmp.lt.s32.totalorder %v894_v43, 1  ;;  %vm288_vm4 = vcmp.eq.s32.totalorder %v283_v24, 1 }
  0x19   : > { %207 = vrot.lane.b32.xlu1 %v751_v9, %s667_s27  ;;  %238 = vrot.lane.b32.xlu0 %v751_v9, %s666_s26  ;;  %v850_v32 = vsel %vm409_vm7, 1, %v664_v3  ;;  %vm384_vm8 = vmand %vm833_vm6, %vm217_vm1  ;;  %vm289_vm7 = vcmp.eq.s32.totalorder %v287_v25, 1 }
  0x1a   : > { %v414_v33 = vrot.slane %v850_v32, %v726_v5  ;;  %v418_v34 = vrot.slane %v850_v32, %v728_v6  ;;  %vm385_vm10 = vmand %vm384_vm8, %vm219_vm2  ;;  %vm348_vm8 = vcmp.lt.s32.totalorder %v894_v43, 127 }
  0x1b   : > { %v865_v35 = vsel %vm385_vm10, 1, %v664_v3  ;;  %vm438_vm1 = vmand %vm833_vm6, %vm275_vm0  ;;  %vm315_vm0 = vcmp.eq.s32.totalorder %v310_v12, 1  ;;  %vm272_vm6 = vcmp.lt.s32.totalorder %v894_v43, 15  ;;  %vm362_vm10 = vcmp.eq.s32.totalorder %v357_v30, 1 }
  0x1c   : > { %v390_v36 = vrot.slane %v865_v35, %v726_v5  ;;  %v394_v37 = vrot.slane %v865_v35, %v728_v6  ;;  %vm439_vm2 = vmand %vm438_vm1, %vm277_vm5  ;;  %vm316_vm5 = vcmp.eq.s32.totalorder %v314_v13, 1  ;;  %vm363_vm1 = vcmp.eq.s32.totalorder %v361_v31, 1 }
  0x1d   : > { %270 = vrot.lane.b32.xlu1 %v751_v9, %s668_s28  ;;  %268 = vrot.lane.b32.xlu0 %v743_v8, %s668_s28  ;;  %v878_v38 = vsel %vm439_vm2, 1, %v664_v3  ;;  %vm405_vm2 = vcmp.lt.s32.totalorder %v894_v43, 112 }
  0x1e   : > { %v444_v39 = vrot.slane %v878_v38, %v726_v5  ;;  %v448_v40 = vrot.slane %v878_v38, %v728_v6 }
  0x21   : > { %346 = vrot.lane.b32.xlu1 %v751_v9, %s669_s29  ;;  %344 = vrot.lane.b32.xlu0 %v743_v8, %s669_s29 }
  0x25   : > { %403 = vrot.lane.b32.xlu1 %v751_v9, %s670_s30  ;;  %401 = vrot.lane.b32.xlu0 %v743_v8, %s670_s30 }
  0x29   : > { %376 = vrot.lane.b32.xlu1 %v751_v9, %s671_s5  ;;  %374 = vrot.lane.b32.xlu0 %v743_v8, %s671_s5 }
  0x2d   : > { %433 = vrot.lane.b32.xlu1 %v751_v9, %s672_s6  ;;  %431 = vrot.lane.b32.xlu0 %v743_v8, %s672_s6 }
  0x31   : > { %469 = vperm.xlu0 %654, %v466_v42  }
  0x83   : > { %v295_v44 = vpop.permute.xlu1 %294  ;;  %v237_v45 = vpop.permute.xlu0 %236 }
  0x87   : > { %v206_v46 = vpop.permute.xlu0 %205  ;;  %v297_v47 = vpop.permute.xlu1 %296 }
  0x88   : > { %v299_v48 = vsel %vm298_vm12, %v295_v44, %v297_v47  ;;  %v300_v49 = vsel %vm298_vm12, %v297_v47, %v295_v44  ;;  %vm971_vm12 = vcmp.eq.s32.totalorder %v414_v33, 1 }
  0x89   : > { %v317_v50 = vsel %vm315_vm0, %v300_v49, -1.0  ;;  %v318_v51 = vsel %vm316_vm5, %v299_v48, -1.0  ;;  %vm978_vm0 = vcmp.eq.s32.totalorder %v418_v34, 1  ;;  %vm378_vm5 = vcmp.lt.s32.totalorder %v894_v43, 113 }
  0x8a   : > { %v321_v54 = vrot.slane %v317_v50, 4  ;;  %v322_v55 = vrot.slane %v318_v51, 4 }
  0x8b   : > { %v208_v58 = vpop.permute.xlu1 %207  ;;  %v239_v59 = vpop.permute.xlu0 %238 }
  0x8c   : > { %325 = vst [vmem:[#allocation2 + $0x10] sm:$0xf0] %v321_v54  ;;  %326 = vst [vmem:[#allocation2 + $0x18] sm:$0xf0] %v322_v55  ;;  %v212_v60 = vsel %vm211_vm11, %v206_v46, %v208_v58  ;;  %v213_v61 = vsel %vm211_vm11, %v208_v58, %v206_v46  ;;  %v241_v62 = vsel %vm240_vm13, %v237_v45, %v239_v59  ;;  %vm986_vm11 = vcmp.eq.s32.totalorder %v390_v36, 1 }
  0x8d   : > { %v242_v63 = vsel %vm240_vm13, %v239_v59, %v237_v45  ;;  %v232_v0 = vsel %vm908_vm9, %v213_v61, -1.0  ;;  %v233_v1 = vsel %vm915_vm14, %v212_v60, -1.0  ;;  %v259_v3 = vsel %vm929_vm3, %v241_v62, -1.0 }
  0x8e   : > { %v258_v2 = vsel %vm922_vm15, %v242_v63, -1.0  ;;  %234 = vst [vmem:[#allocation2] sm:$0xf] %v232_v0  ;;  %235 = vst [vmem:[#allocation2 + $0x8] sm:$0xf] %v233_v1  ;;  %v263_v7 = vrot.slane %v259_v3, 4 }
  0x8f   : > { %v262_v4 = vrot.slane %v258_v2, 4  ;;  %v271_v8 = vpop.permute.xlu1 %270  ;;  %v269_v9 = vpop.permute.xlu0 %268  ;;  %vm997_vm13 = vcmp.eq.s32.totalorder %v394_v37, 1  ;;  %vm435_vm9 = vcmp.lt.s32.totalorder %v894_v43, 111  ;;  %vm449_vm14 = vcmp.eq.s32.totalorder %v444_v39, 1  ;;  %v455_v39 = vld [vmem:[%s1027_s1] sm:$0xff] }
  0x90   : > { %267 = vst [vmem:[#allocation2 + $0x8] sm:$0xf0] %v263_v7  ;;  %v273_v10 = vsel %vm272_vm6, %v269_v9, %v271_v8  ;;  %v274_v11 = vsel %vm272_vm6, %v271_v8, %v269_v9  ;;  %vm450_vm15 = vcmp.eq.s32.totalorder %v448_v40, 1  ;;  %vm476_vm3 = vcmask 1043456  }
  0x91   : > { %266 = vst [vmem:[#allocation2] sm:$0xf0] %v262_v4  ;;  %v290_v12 = vsel %vm288_vm4, %v274_v11, -1.0  ;;  %v291_v13 = vsel %vm289_vm7, %v273_v10, -1.0  ;;  %vm472_vm6 = vcmask 293888  }
  0x92   : > { %292 = vst [vmem:[#allocation2 + $0x10] sm:$0xf] %v290_v12  ;;  %293 = vst [vmem:[#allocation2 + $0x18] sm:$0xf] %v291_v13 }
  0x93   : > { %v347_v14 = vpop.permute.xlu1 %346  ;;  %v345_v15 = vpop.permute.xlu0 %344 }
  0x94   : > { %v349_v16 = vsel %vm348_vm8, %v345_v15, %v347_v14  ;;  %v350_v17 = vsel %vm348_vm8, %v347_v14, %v345_v15 }
  0x95   : > { %v364_v18 = vsel %vm362_vm10, %v349_v16, -1.0  ;;  %v365_v19 = vsel %vm363_vm1, %v350_v17, -1.0 }
  0x96   : > { %v368_v20 = vrot.slane %v364_v18, 4  ;;  %v369_v21 = vrot.slane %v365_v19, 4 }
  0x97   : > { %v404_v24 = vpop.permute.xlu1 %403  ;;  %v402_v25 = vpop.permute.xlu0 %401  ;;  %v457_v29 = vld [vmem:[#allocation2 + $0x8] sm:$0xff] }
  0x98   : > { %372 = vst [vmem:[#allocation2 + $0x20] sm:$0xf0] %v368_v20  ;;  %373 = vst [vmem:[#allocation2 + $0x28] sm:$0xf0] %v369_v21  ;;  %v406_v26 = vsel %vm405_vm2, %v402_v25, %v404_v24  ;;  %v407_v27 = vsel %vm405_vm2, %v404_v24, %v402_v25  ;;  %v456_v34 = vld [vmem:[#allocation2] sm:$0xff] }
  0x99   : > { %v421_v30 = vsel %vm971_vm12, %v406_v26, -1.0  ;;  %v422_v31 = vsel %vm978_vm0, %v407_v27, -1.0  ;;  %v459_v33 = vld [vmem:[#allocation2 + $0x18] sm:$0xff]  ;;  %v458_v36 = vld [vmem:[#allocation2 + $0x10] sm:$0xff] }
  0x9a   : > { %v425_v41 = vrot.slane %v421_v30, 4  ;;  %v426_v42 = vrot.slane %v422_v31, 4  ;;  %v628_v44 = vpack.c.bf16 %v459_v33, %v457_v29  ;;  %v630_v45 = vpack.c.bf16 %v458_v36, %v456_v34 }
  0x9b   : > { %v377_v46 = vpop.permute.xlu1 %376  ;;  %v375_v47 = vpop.permute.xlu0 %374 }
  0x9c   : > { %429 = vst [vmem:[#allocation2 + $0x30] sm:$0xf0] %v425_v41  ;;  %430 = vst [vmem:[#allocation2 + $0x38] sm:$0xf0] %v426_v42  ;;  %v379_v48 = vsel %vm378_vm5, %v375_v47, %v377_v46  ;;  %v380_v35 = vsel %vm378_vm5, %v377_v46, %v375_v47  ;;  %629 = vmatprep.subr.bf16.mxu0 %v628_v44 }
  0x9d   : > { %v397_v37 = vsel %vm986_vm11, %v379_v48, -1.0  ;;  %v398_v49 = vsel %vm997_vm13, %v380_v35, -1.0  ;;  %631 = vmatpush1.bf16.msra.mxu0 %v630_v45 }
  0x9e   : > { %399 = vst [vmem:[#allocation2 + $0x30] sm:$0xf] %v397_v37  ;;  %400 = vst [vmem:[#allocation2 + $0x38] sm:$0xf] %v398_v49 }
  0x9f   : > { %v434_v50 = vpop.permute.xlu1 %433  ;;  %v432_v51 = vpop.permute.xlu0 %431  ;;  %v461_v56 = vld [vmem:[#allocation2 + $0x28] sm:$0xff]  ;;  %v460_v57 = vld [vmem:[#allocation2 + $0x20] sm:$0xff] }
  0xa0   : > { %v436_v52 = vsel %vm435_vm9, %v432_v51, %v434_v50  ;;  %v437_v53 = vsel %vm435_vm9, %v434_v50, %v432_v51 }
  0xa1   : > { %v451_v54 = vsel %vm449_vm14, %v436_v52, -1.0  ;;  %v452_v55 = vsel %vm450_vm15, %v437_v53, -1.0 }
  0xa2   : > { %453 = vst [vmem:[#allocation2 + $0x40] sm:$0xf] %v451_v54  ;;  %454 = vst [vmem:[#allocation2 + $0x48] sm:$0xf] %v452_v55 }
  0xa5   : > { %v463_v43 = vld [vmem:[#allocation2 + $0x38] sm:$0xff]  ;;  %v462_v58 = vld [vmem:[#allocation2 + $0x30] sm:$0xff] }
  0xa6   : > { %v632_v59 = vpack.c.bf16 %v463_v43, %v461_v56  ;;  %v634_v5 = vpack.c.bf16 %v462_v58, %v460_v57 }
  0xa8   : > { %633 = vmatprep.subr.bf16.mxu0 %v632_v59 }
  0xa9   : > { %635 = vmatpush1.bf16.msra.mxu0 %v634_v5  ;;  %v465_v6 = vld [vmem:[#allocation2 + $0x48] sm:$0xf]  ;;  %v464_v38 = vld [vmem:[#allocation2 + $0x40] sm:$0xf] }
  0xaa   : > { %621 = vmatprep.subr.msk.mxu0 %vm476_vm3, %v465_v6 }
  0xad   : > { %622 = vmatpush1.msk.msra.mxu0 %vm476_vm3, %v464_v38 }
  0xae   : > { %623 = vmatmul.mubr.msk.f32.vlgmr.msra.gmra.mrb[0].mxu0 %vm472_vm6, %v455_v39 }
  0xb0   : > { %v470_v40 = vpop.permute.xlu0 %469 }
 0x181   : > { %v549_v60 = vpop.f32.mrb[0].mxu0 }
 0x182   : > { %v550_v61 = vadd.f32 %v549_v60, %v470_v40  ;;  %v551_v62 = vpop.f32.mrb[1].mxu0 }
 0x183   : > { %v552_v63 = vadd.f32 %v551_v62, %v470_v40 }
 0x184   : > { %554 = vst [vmem:[%s197_s14] sm:$0xff] %v550_v61 }
 0x185   : > { %555 = vst [vmem:[%s197_s14 + $0x8] sm:$0xff] %v552_v63 }
 0x186 PF: > { %s14_s15 = sadd.s32 1, %s662_s15  }
 0x187   : > { %p11_p4 = scmp.ge.s32.totalorder %s14_s15, 4  }
 0x189   :  { %13 = sbr.rel (!%p11_p4) target bundleno = 1 (0x1), region = 67 }

</bundles_post_ra>
